<compile_context>
chip_gen: v5e
topology: v5e:2x2
jax: 0.10.0
libtpu: 0.0.40
codegen_flags: <defaults>
</compile_context>

<pallas_src>
import functools

import jax
import jax.numpy as jnp
from jax import lax
from jax.experimental import pallas as pl
from jax.experimental.pallas import tpu as pltpu


def _dcn_kernel(x_ref, w_ref, p_ref, c_ref, o_ref, acc_ref, *,
                groups, cin_g, cout_g, ksize, cin, t_out, t_lane, bblk,
                tap_phase, tap_off, use_vpu, keep_vals, row_blocks):
    """One batch-block per grid step.

    x_ref  : (bblk, stride*Cin, L_ph)  phase-split, zero-padded raw input
    w_ref  : (Cout, ksize*cin_g)       weight, tap k in columns [k*cin_g, ...)
    p_ref  : (Cout, 3)                 packed [conv bias | gamma | beta]
    c_ref  : (2,) f32 in SMEM          [t_out*sum(bias), t_out*sum(bias^2)]
    o_ref  : (bblk, Cout, t_lane)
    acc_ref: (Cout, t_lane) f32 scratch (dummy (8,128) when keep_vals)
    """
    cout = groups * cout_g
    need_mask = t_lane != t_out
    inv_n = 1.0 / float(cout * t_out)

    bias = p_ref[:, 0:1].astype(jnp.float32)          # (Cout, 1)
    gamma = p_ref[:, 1:2].astype(jnp.float32)
    beta = p_ref[:, 2:3].astype(jnp.float32)
    tsum_b = c_ref[0]                                  # t_out * sum(bias)
    tsum_b2 = c_ref[1]                                 # t_out * sum(bias^2)

    if need_mask:
        lane = lax.broadcasted_iota(jnp.int32, (1, t_lane), 1)
        maskf = (lane < t_out).astype(jnp.float32)     # (1, t_lane)

    def conv_block(b, r0, r1):
        """Conv output rows [r0, r1) for batch element b; taps built in-kernel."""
        y = None
        for k in range(ksize):
            lo = tap_off[k]
            if use_vpu:
                # pure depthwise: output row r uses input row r of tap-k phase
                xr0 = tap_phase[k] * cin + r0
                xk = x_ref[b, xr0:xr0 + (r1 - r0),
                           lo:lo + t_lane].astype(jnp.float32)
                wk = w_ref[r0:r1, k:k + 1].astype(jnp.float32)     # (rows, 1)
                yk = wk * xk                                        # VPU FMA
            else:
                g = r0 // cout_g
                xr0 = tap_phase[k] * cin + g * cin_g
                xk = x_ref[b, xr0:xr0 + cin_g, lo:lo + t_lane]
                wk = w_ref[r0:r1, k * cin_g:(k + 1) * cin_g]        # (rows, cin_g)
                yk = jnp.dot(wk, xk, preferred_element_type=jnp.float32)
            y = yk if y is None else y + yk
        return y

    for b in range(bblk):
        # ---- Conv1d with fused first-pass GlobLN statistics -----------------
        s1 = jnp.float32(0.0)    # sum(conv)
        s2 = jnp.float32(0.0)    # sum(conv^2)
        cr = jnp.float32(0.0)    # sum(bias * rowsum(conv))
        ys = []
        for (r0, r1) in row_blocks:
            y = conv_block(b, r0, r1)
            if need_mask:
                y = y * maskf                 # exclude padded lanes from stats
            rs = jnp.sum(y, axis=1, keepdims=True)        # (rows, 1)
            s1 = s1 + jnp.sum(rs)
            cr = cr + jnp.sum(rs * bias[r0:r1])
            s2 = s2 + jnp.sum(y * y)
            if keep_vals:
                ys.append(y)
            else:
                acc_ref[r0:r1, :] = y

        # ---- GlobLN of y = conv + bias over the valid (Cout, Tout) area -----
        # Single-pass E[x^2]-E[x]^2 (clamped); fine at this tolerance.
        s1t = s1 + tsum_b
        s2t = s2 + 2.0 * cr + tsum_b2
        mean = s1t * inv_n
        var = jnp.maximum(s2t * inv_n - mean * mean, 0.0)
        scale = gamma * lax.rsqrt(var + 1e-8)             # (Cout, 1), EUP rsqrt
        shift = beta + (bias - mean) * scale               # conv bias folded in

        if keep_vals:
            for (r0, r1), y in zip(row_blocks, ys):
                o_ref[b, r0:r1, :] = (
                    y * scale[r0:r1] + shift[r0:r1]).astype(o_ref.dtype)
        else:
            o_ref[b, :, :] = (acc_ref[...] * scale + shift).astype(o_ref.dtype)


def _round_up(x, m):
    return ((x + m - 1) // m) * m


def dilated_conv_norm(x, weight, bias, gamma, beta, *, ksize, stride=1, d=1,
                      groups=1, block_batch=None, compute_dtype=None,
                      out_dtype=None):
    """Fused Conv1d(nIn->nOut, ksize, stride, dilation=d, groups) + GlobLN.

    x: (B, Cin, T) -> (B, Cout, Tout).
    """
    B, Cin, T = x.shape
    Cout = weight.shape[0]
    assert Cin % groups == 0 and Cout % groups == 0
    cin_g = Cin // groups
    cout_g = Cout // groups
    assert weight.shape == (Cout, cin_g, ksize)
    compute_dtype = jnp.dtype(x.dtype if compute_dtype is None else compute_dtype)
    out_dtype = jnp.dtype(x.dtype if out_dtype is None else out_dtype)

    # ---- conv geometry ------------------------------------------------------
    pad = (ksize - 1) // 2 * d
    t_in = T + 2 * pad
    t_out = (t_in - d * (ksize - 1) - 1) // stride + 1
    t_lane = _round_up(t_out, 128)                      # lane-dense output width
    # Tap k reads padded-input position t*stride + k*d.  Split the input into
    # `stride` phases (rows p*Cin + c hold x_pad[c, p::stride]) so every tap is
    # a contiguous lane slice: phase (k*d)%stride at lane offset (k*d)//stride.
    tap_off = tuple((k * d) // stride for k in range(ksize))
    tap_phase = tuple((k * d) % stride for k in range(ksize))
    l_ph = max(tap_off) + t_lane                        # per-phase lane length
    l_total = stride * l_ph

    # ---- input prep: one pad (+ one phase-split pass when stride > 1) -------
    xph = jnp.pad(x, ((0, 0), (0, 0), (pad, max(0, l_total - pad - T))))
    if xph.shape[2] > l_total:        # tail samples no valid output ever reads
        xph = xph[:, :, :l_total]
    xph = xph.astype(compute_dtype)
    if stride > 1:
        xph = (xph.reshape(B, Cin, l_ph, stride)
                  .transpose(0, 3, 1, 2)
                  .reshape(B, stride * Cin, l_ph))
    x_rows = stride * Cin

    # ---- weights / params ---------------------------------------------------
    # (Cout, cin_g, K) -> (Cout, K*cin_g): tap k occupies columns [k*cin_g, ..)
    w2 = jnp.transpose(weight, (0, 2, 1)).reshape(Cout, ksize * cin_g)
    w2 = w2.astype(compute_dtype)
    bias32 = bias.astype(jnp.float32)
    params = jnp.stack([bias32, gamma.astype(jnp.float32),
                        beta.astype(jnp.float32)], axis=1)          # (Cout, 3)
    consts = jnp.stack([jnp.float32(t_out) * jnp.sum(bias32),
                        jnp.float32(t_out) * jnp.sum(bias32 * bias32)])

    # ---- kernel shape decisions ---------------------------------------------
    use_vpu = (cin_g == 1 and cout_g == 1)      # pure depthwise: VPU FMA path
    if use_vpu:
        n_blk = min(8, max(1, -(-Cout // 8)))
        rows = -(-Cout // n_blk)
        row_blocks = tuple((r, min(Cout, r + rows)) for r in range(0, Cout, rows))
    else:
        row_blocks = tuple((g * cout_g, (g + 1) * cout_g) for g in range(groups))
    keep_vals = Cout * t_lane * 4 <= (128 << 10)   # skip acc-scratch round trip
    acc_shape = (8, 128) if keep_vals else (Cout, t_lane)

    # ---- batch-block sizing from the per-generation VMEM budget -------------
    isz = compute_dtype.itemsize
    osz = out_dtype.itemsize
    xb = x_rows * l_ph * isz                    # input bytes per batch element
    ob = Cout * t_lane * osz                    # output bytes per batch element
    fixed = (2 * (Cout * ksize * cin_g * isz + Cout * 3 * 4)
             + acc_shape[0] * acc_shape[1] * 4 + (64 << 10))
    try:
        cap = int(getattr(pltpu.get_tpu_info(), "vmem_capacity_bytes", 0) or 0)
    except Exception:
        cap = 0
    if cap <= 0:
        cap = 64 << 20              # conservative: v7x has 64 MiB per TensorCore
    budget = cap * 3 // 4           # headroom for compiler temporaries

    if block_batch is None:
        target = 12 << 20           # MiB-scale blocks amortize per-step overhead
        bblk = max(1, min(B, target // max(1, xb + ob)))
        if B >= 2:
            bblk = min(bblk, (B + 1) // 2)   # keep >= 2 grid steps (v7x: 2 TCs)
    else:
        bblk = max(1, min(B, int(block_batch)))
    while bblk > 1 and 2 * bblk * (xb + ob) + fixed > budget:
        bblk -= 1
    need = 2 * bblk * (xb + ob) + fixed
    # Never declare a limit below the actual footprint; stay under the queried
    # capacity whenever the footprint allows it.
    vmem_limit = int(max(32 << 20, min(need * 5 // 4, cap), need))

    nb = -(-B // bblk)
    b_pad = nb * bblk
    if b_pad != B:
        xph = jnp.pad(xph, ((0, b_pad - B), (0, 0), (0, 0)))

    kernel = functools.partial(
        _dcn_kernel, groups=groups, cin_g=cin_g, cout_g=cout_g, ksize=ksize,
        cin=Cin, t_out=t_out, t_lane=t_lane, bblk=bblk, tap_phase=tap_phase,
        tap_off=tap_off, use_vpu=use_vpu, keep_vals=keep_vals,
        row_blocks=row_blocks)

    out = pl.pallas_call(
        kernel,
        out_shape=jax.ShapeDtypeStruct((b_pad, Cout, t_lane), out_dtype),
        grid=(nb,),
        in_specs=[
            pl.BlockSpec((bblk, x_rows, l_ph), lambda i: (i, 0, 0)),
            pl.BlockSpec((Cout, ksize * cin_g), lambda i: (0, 0)),
            pl.BlockSpec((Cout, 3), lambda i: (0, 0)),
            pl.BlockSpec(memory_space=pltpu.MemorySpace.SMEM),
        ],
        out_specs=pl.BlockSpec((bblk, Cout, t_lane), lambda i: (i, 0, 0)),
        scratch_shapes=[pltpu.VMEM(acc_shape, jnp.float32)],
        compiler_params=pltpu.CompilerParams(
            dimension_semantics=("parallel",),
            vmem_limit_bytes=vmem_limit),
    )(xph, w2, params, consts)

    return out[:B, :, :t_out]


def _reference(x, weight, bias, gamma, beta, *, ksize, stride, d, groups):
    """Pure-JAX reference mirroring the PyTorch module."""
    pad = (ksize - 1) // 2 * d
    y = lax.conv_general_dilated(
        x, weight,
        window_strides=(stride,),
        padding=[(pad, pad)],
        rhs_dilation=(d,),
        dimension_numbers=("NCH", "OIH", "NCH"),
        feature_group_count=groups,
    ) + bias[None, :, None]
    mean = jnp.mean(y, axis=(1, 2), keepdims=True)
    var = jnp.mean((y - mean) ** 2, axis=(1, 2), keepdims=True)
    normed = (y - mean) / jnp.sqrt(var + 1e-8)
    return gamma[None, :, None] * normed + beta[None, :, None]


def _make_params(key, B, nIn, nOut, T, kSize, groups):
    kx, kw, kb, kg, kt = jax.random.split(key, 5)
    x = jax.random.normal(kx, (B, nIn, T), dtype=jnp.float32)
    fan_in = (nIn // groups) * kSize
    weight = jax.random.normal(kw, (nOut, nIn // groups, kSize),
                               dtype=jnp.float32) / jnp.sqrt(fan_in)
    bias = 0.1 * jax.random.normal(kb, (nOut,), dtype=jnp.float32)
    gamma = 1.0 + 0.1 * jax.random.normal(kg, (nOut,), dtype=jnp.float32)
    beta = 0.05 * jax.random.normal(kt, (nOut,), dtype=jnp.float32)
    return x, weight, bias, gamma, beta


if __name__ == "__main__":
    def check(name, out, ref, tol):
        assert out.shape == ref.shape, (name, out.shape, ref.shape)
        err = float(jnp.max(jnp.abs(out - ref)))
        assert err <= tol, f"{name}: max abs err {err}"

    # ---- Config 1: DilatedConvNorm(nIn=4, nOut=8, kSize=5, stride=1, d=2) ---
    B, nIn, nOut, T = 2, 4, 8, 16
    x1, w1, b1, g1, be1 = _make_params(jax.random.PRNGKey(0), B, nIn, nOut, T, 5, 1)
    out1 = jax.block_until_ready(dilated_conv_norm(
        x1, w1, b1, g1, be1, ksize=5, stride=1, d=2, groups=1))
    ref1 = _reference(x1, w1, b1, g1, be1, ksize=5, stride=1, d=2, groups=1)
    check("dense-dilated-f32", out1, ref1, 2e-4)

    # ---- Same config with bf16 inputs/weights (f32 accumulation / LN) -------
    out1b = jax.block_until_ready(dilated_conv_norm(
        x1, w1, b1, g1, be1, ksize=5, stride=1, d=2, groups=1,
        compute_dtype=jnp.bfloat16))
    check("dense-dilated-bf16", out1b, ref1, 1.5e-1)

    # ---- Config 2: strided + grouped (phase split, groups, batch padding) ---
    x2, w2_, b2, g2_, be2 = _make_params(jax.random.PRNGKey(1), 3, 4, 8, 16, 5, 2)
    out2 = jax.block_until_ready(dilated_conv_norm(
        x2, w2_, b2, g2_, be2, ksize=5, stride=2, d=1, groups=2, block_batch=2))
    ref2 = _reference(x2, w2_, b2, g2_, be2, ksize=5, stride=2, d=1, groups=2)
    check("grouped-strided", out2, ref2, 2e-4)

    # ---- Config 3: depthwise (AFRCNN style), exercises the VPU path ---------
    x3, w3, b3, g3, be3 = _make_params(jax.random.PRNGKey(2), 2, 16, 16, 32, 5, 16)
    out3 = jax.block_until_ready(dilated_conv_norm(
        x3, w3, b3, g3, be3, ksize=5, stride=1, d=1, groups=16))
    ref3 = _reference(x3, w3, b3, g3, be3, ksize=5, stride=1, d=1, groups=16)
    check("depthwise", out3, ref3, 2e-4)

    # ---- Config 4: depthwise downsampler (stride 2), VPU + phase split ------
    x4, w4, b4, g4, be4 = _make_params(jax.random.PRNGKey(3), 2, 16, 16, 32, 5, 16)
    out4 = jax.block_until_ready(dilated_conv_norm(
        x4, w4, b4, g4, be4, ksize=5, stride=2, d=1, groups=16))
    ref4 = _reference(x4, w4, b4, g4, be4, ksize=5, stride=2, d=1, groups=16)
    check("depthwise-strided", out4, ref4, 2e-4)

    print("KERNEL_OK")
</pallas_src>

<mosaic_0001>
module attributes {stable_mosaic.version = 11 : i64} {
  func.func @_dcn_kernel(%arg0: i32, %arg1: memref<1x4x136xf32, #tpu.memory_space<vmem>>, %arg2: memref<8x20xf32, #tpu.memory_space<vmem>>, %arg3: memref<8x3xf32, #tpu.memory_space<vmem>>, %arg4: memref<2xf32, #tpu.memory_space<smem>>, %arg5: memref<1x8x128xf32, #tpu.memory_space<vmem>>, %arg6: memref<8x128xf32, #tpu.memory_space<vmem>>) attributes {dimension_semantics = [#tpu.dimension_semantics<parallel>], iteration_bounds = array<i64: 2>, scalar_prefetch = 0 : i64, scratch_operands = 1 : i64, tpu.core_type = #tpu.core_type<tc>, window_params = [{transform_indices = @transform_0, window_bounds = array<i64: 1, 4, 136>}, {pipeline_mode = #tpu.pipeline_mode<synchronous>, transform_indices = @transform_1, window_bounds = array<i64: 8, 20>}, {pipeline_mode = #tpu.pipeline_mode<synchronous>, transform_indices = @transform_2, window_bounds = array<i64: 8, 3>}, {transform_indices = @transform_3, window_bounds = array<i64: 2>}, {transform_indices = @transform_4, window_bounds = array<i64: 1, 8, 128>}]} {
    %c0 = arith.constant 0 : index
    %c0_0 = arith.constant 0 : index
    %0 = vector.load %arg3[%c0, %c0_0] : memref<8x3xf32, #tpu.memory_space<vmem>>, vector<8x1xf32>
    %c0_1 = arith.constant 0 : index
    %c1 = arith.constant 1 : index
    %1 = vector.load %arg3[%c0_1, %c1] : memref<8x3xf32, #tpu.memory_space<vmem>>, vector<8x1xf32>
    %c0_2 = arith.constant 0 : index
    %c2 = arith.constant 2 : index
    %2 = vector.load %arg3[%c0_2, %c2] : memref<8x3xf32, #tpu.memory_space<vmem>>, vector<8x1xf32>
    %c0_3 = arith.constant 0 : index
    %3 = memref.load %arg4[%c0_3] : memref<2xf32, #tpu.memory_space<smem>>
    %c1_4 = arith.constant 1 : index
    %4 = memref.load %arg4[%c1_4] : memref<2xf32, #tpu.memory_space<smem>>
    %5 = tpu.iota {dimensions = array<i32: 1>} : vector<1x128xi32>
    %c16_i32 = arith.constant 16 : i32
    %6 = vector.broadcast %c16_i32 : i32 to vector<1x128xi32>
    %7 = arith.cmpi slt, %5, %6 : vector<1x128xi32>
    %8 = arith.extui %7 : vector<1x128xi1> to vector<1x128xi32>
    %9 = arith.sitofp %8 : vector<1x128xi32> to vector<1x128xf32>
    %c0_5 = arith.constant 0 : index
    %c0_6 = arith.constant 0 : index
    %c0_7 = arith.constant 0 : index
    %10 = vector.load %arg1[%c0_5, %c0_6, %c0_7] : memref<1x4x136xf32, #tpu.memory_space<vmem>>, vector<1x4x128xf32>
    %11 = vector.shape_cast %10 : vector<1x4x128xf32> to vector<4x128xf32>
    %c0_8 = arith.constant 0 : index
    %c0_9 = arith.constant 0 : index
    %12 = vector.load %arg2[%c0_8, %c0_9] : memref<8x20xf32, #tpu.memory_space<vmem>>, vector<8x4xf32>
    %cst = arith.constant dense<0.000000e+00> : vector<8x128xf32>
    %13 = tpu.matmul %12, %11, %cst {dimension_numbers = #tpu.dot_dimension_numbers<[1], [0], [0], [1], [0, 0, 1, 1], [], []>} : vector<8x4xf32>, vector<4x128xf32>, vector<8x128xf32> -> vector<8x128xf32>
    %c0_10 = arith.constant 0 : index
    %c0_11 = arith.constant 0 : index
    %c2_12 = arith.constant 2 : index
    %14 = vector.load %arg1[%c0_10, %c0_11, %c2_12] : memref<1x4x136xf32, #tpu.memory_space<vmem>>, vector<1x4x128xf32>
    %15 = vector.shape_cast %14 : vector<1x4x128xf32> to vector<4x128xf32>
    %c0_13 = arith.constant 0 : index
    %c4 = arith.constant 4 : index
    %16 = vector.load %arg2[%c0_13, %c4] : memref<8x20xf32, #tpu.memory_space<vmem>>, vector<8x4xf32>
    %cst_14 = arith.constant dense<0.000000e+00> : vector<8x128xf32>
    %17 = tpu.matmul %16, %15, %cst_14 {dimension_numbers = #tpu.dot_dimension_numbers<[1], [0], [0], [1], [0, 0, 1, 1], [], []>} : vector<8x4xf32>, vector<4x128xf32>, vector<8x128xf32> -> vector<8x128xf32>
    %18 = arith.addf %13, %17 : vector<8x128xf32>
    %c0_15 = arith.constant 0 : index
    %c0_16 = arith.constant 0 : index
    %c4_17 = arith.constant 4 : index
    %19 = vector.load %arg1[%c0_15, %c0_16, %c4_17] : memref<1x4x136xf32, #tpu.memory_space<vmem>>, vector<1x4x128xf32>
    %20 = vector.shape_cast %19 : vector<1x4x128xf32> to vector<4x128xf32>
    %c0_18 = arith.constant 0 : index
    %c8 = arith.constant 8 : index
    %21 = vector.load %arg2[%c0_18, %c8] : memref<8x20xf32, #tpu.memory_space<vmem>>, vector<8x4xf32>
    %cst_19 = arith.constant dense<0.000000e+00> : vector<8x128xf32>
    %22 = tpu.matmul %21, %20, %cst_19 {dimension_numbers = #tpu.dot_dimension_numbers<[1], [0], [0], [1], [0, 0, 1, 1], [], []>} : vector<8x4xf32>, vector<4x128xf32>, vector<8x128xf32> -> vector<8x128xf32>
    %23 = arith.addf %18, %22 : vector<8x128xf32>
    %c0_20 = arith.constant 0 : index
    %c0_21 = arith.constant 0 : index
    %c6 = arith.constant 6 : index
    %24 = vector.load %arg1[%c0_20, %c0_21, %c6] : memref<1x4x136xf32, #tpu.memory_space<vmem>>, vector<1x4x128xf32>
    %25 = vector.shape_cast %24 : vector<1x4x128xf32> to vector<4x128xf32>
    %c0_22 = arith.constant 0 : index
    %c12 = arith.constant 12 : index
    %26 = vector.load %arg2[%c0_22, %c12] : memref<8x20xf32, #tpu.memory_space<vmem>>, vector<8x4xf32>
    %cst_23 = arith.constant dense<0.000000e+00> : vector<8x128xf32>
    %27 = tpu.matmul %26, %25, %cst_23 {dimension_numbers = #tpu.dot_dimension_numbers<[1], [0], [0], [1], [0, 0, 1, 1], [], []>} : vector<8x4xf32>, vector<4x128xf32>, vector<8x128xf32> -> vector<8x128xf32>
    %28 = arith.addf %23, %27 : vector<8x128xf32>
    %c0_24 = arith.constant 0 : index
    %c0_25 = arith.constant 0 : index
    %c8_26 = arith.constant 8 : index
    %29 = vector.load %arg1[%c0_24, %c0_25, %c8_26] : memref<1x4x136xf32, #tpu.memory_space<vmem>>, vector<1x4x128xf32>
    %30 = vector.shape_cast %29 : vector<1x4x128xf32> to vector<4x128xf32>
    %c0_27 = arith.constant 0 : index
    %c16 = arith.constant 16 : index
    %31 = vector.load %arg2[%c0_27, %c16] : memref<8x20xf32, #tpu.memory_space<vmem>>, vector<8x4xf32>
    %cst_28 = arith.constant dense<0.000000e+00> : vector<8x128xf32>
    %32 = tpu.matmul %31, %30, %cst_28 {dimension_numbers = #tpu.dot_dimension_numbers<[1], [0], [0], [1], [0, 0, 1, 1], [], []>} : vector<8x4xf32>, vector<4x128xf32>, vector<8x128xf32> -> vector<8x128xf32>
    %33 = arith.addf %28, %32 : vector<8x128xf32>
    %34 = vector.broadcast %9 : vector<1x128xf32> to vector<8x128xf32>
    %35 = arith.mulf %33, %34 : vector<8x128xf32>
    %cst_29 = arith.constant dense<0.000000e+00> : vector<8xf32>
    %36 = vector.multi_reduction <add>, %35, %cst_29 [1] : vector<8x128xf32> to vector<8xf32>
    %37 = vector.shape_cast %36 : vector<8xf32> to vector<8x1xf32>
    %38 = vector.shape_cast %37 : vector<8x1xf32> to vector<1x8x1xf32>
    %cst_30 = arith.constant dense<0.000000e+00> : vector<1xf32>
    %39 = vector.multi_reduction <add>, %38, %cst_30 [1, 2] : vector<1x8x1xf32> to vector<1xf32>
    %40 = vector.shape_cast %39 : vector<1xf32> to vector<1x1x1xf32>
    %41 = vector.extract %40[0, 0, 0] : f32 from vector<1x1x1xf32>
    %cst_31 = arith.constant 0.000000e+00 : f32
    %42 = arith.addf %cst_31, %41 : f32
    %43 = arith.mulf %37, %0 : vector<8x1xf32>
    %44 = vector.shape_cast %43 : vector<8x1xf32> to vector<1x8x1xf32>
    %cst_32 = arith.constant dense<0.000000e+00> : vector<1xf32>
    %45 = vector.multi_reduction <add>, %44, %cst_32 [1, 2] : vector<1x8x1xf32> to vector<1xf32>
    %46 = vector.shape_cast %45 : vector<1xf32> to vector<1x1x1xf32>
    %47 = vector.extract %46[0, 0, 0] : f32 from vector<1x1x1xf32>
    %cst_33 = arith.constant 0.000000e+00 : f32
    %48 = arith.addf %cst_33, %47 : f32
    %49 = arith.mulf %35, %35 : vector<8x128xf32>
    %50 = vector.shape_cast %49 : vector<8x128xf32> to vector<1x8x128xf32>
    %cst_34 = arith.constant dense<0.000000e+00> : vector<1xf32>
    %51 = vector.multi_reduction <add>, %50, %cst_34 [1, 2] : vector<1x8x128xf32> to vector<1xf32>
    %52 = vector.shape_cast %51 : vector<1xf32> to vector<1x1x1xf32>
    %53 = vector.extract %52[0, 0, 0] : f32 from vector<1x1x1xf32>
    %cst_35 = arith.constant 0.000000e+00 : f32
    %54 = arith.addf %cst_35, %53 : f32
    %55 = arith.addf %42, %3 : f32
    %cst_36 = arith.constant 2.000000e+00 : f32
    %56 = arith.mulf %cst_36, %48 : f32
    %57 = arith.addf %54, %56 : f32
    %58 = arith.addf %57, %4 : f32
    %cst_37 = arith.constant 7.812500e-03 : f32
    %59 = arith.mulf %55, %cst_37 : f32
    %cst_38 = arith.constant 7.812500e-03 : f32
    %60 = arith.mulf %58, %cst_38 : f32
    %61 = arith.mulf %59, %59 : f32
    %62 = arith.subf %60, %61 : f32
    %cst_39 = arith.constant 0.000000e+00 : f32
    %63 = arith.maximumf %62, %cst_39 : f32
    %cst_40 = arith.constant 9.99999993E-9 : f32
    %64 = arith.addf %63, %cst_40 : f32
    %65 = math.rsqrt %64 : f32
    %66 = vector.broadcast %65 : f32 to vector<8x1xf32>
    %67 = arith.mulf %1, %66 : vector<8x1xf32>
    %68 = vector.broadcast %59 : f32 to vector<8x1xf32>
    %69 = arith.subf %0, %68 : vector<8x1xf32>
    %70 = arith.mulf %69, %67 : vector<8x1xf32>
    %71 = arith.addf %2, %70 : vector<8x1xf32>
    %72 = vector.broadcast %67 : vector<8x1xf32> to vector<8x128xf32>
    %73 = arith.mulf %35, %72 : vector<8x128xf32>
    %74 = vector.broadcast %71 : vector<8x1xf32> to vector<8x128xf32>
    %75 = arith.addf %73, %74 : vector<8x128xf32>
    %c0_41 = arith.constant 0 : index
    %c0_42 = arith.constant 0 : index
    %c0_43 = arith.constant 0 : index
    %76 = vector.load %arg5[%c0_41, %c0_42, %c0_43] : memref<1x8x128xf32, #tpu.memory_space<vmem>>, vector<1x8x128xf32>
    %77 = vector.shape_cast %76 : vector<1x8x128xf32> to vector<8x128xf32>
    %78 = vector.shape_cast %75 : vector<8x128xf32> to vector<1x8x128xf32>
    tpu.vector_store %arg5[%c0_41, %c0_42, %c0_43], %78 {strides = array<i32>} : memref<1x8x128xf32, #tpu.memory_space<vmem>>, vector<1x8x128xf32>,
    return
  }
  func.func @transform_0(%arg0: i32) -> (i32, i32, i32) {
    %c0_i32 = arith.constant 0 : i32
    %c0_i32_0 = arith.constant 0 : i32
    %c0_i32_1 = arith.constant 0 : i32
    return %arg0, %c0_i32, %c0_i32_0 : i32, i32, i32
  }
  func.func @transform_1(%arg0: i32) -> (i32, i32) {
    %c0_i32 = arith.constant 0 : i32
    %c0_i32_0 = arith.constant 0 : i32
    %c0_i32_1 = arith.constant 0 : i32
    return %c0_i32, %c0_i32_0 : i32, i32
  }
  func.func @transform_2(%arg0: i32) -> (i32, i32) {
    %c0_i32 = arith.constant 0 : i32
    %c0_i32_0 = arith.constant 0 : i32
    %c0_i32_1 = arith.constant 0 : i32
    return %c0_i32, %c0_i32_0 : i32, i32
  }
  func.func @transform_3(%arg0: i32) -> i32 {
    %c0_i32 = arith.constant 0 : i32
    %c0_i32_0 = arith.constant 0 : i32
    return %c0_i32 : i32
  }
  func.func @transform_4(%arg0: i32) -> (i32, i32, i32) {
    %c0_i32 = arith.constant 0 : i32
    %c0_i32_0 = arith.constant 0 : i32
    %c0_i32_1 = arith.constant 0 : i32
    return %arg0, %c0_i32, %c0_i32_0 : i32, i32, i32
  }
}

</mosaic_0001>

<bundles_post_ra>
// kernel: tpu_custom_call.1
= control target key start
LH: loop header
LB: loop body
LE: loop exit
PB: predicated region body
PF: predicated region fallthrough
CT: control target
= control target key end

     0   :  { %9 = vsyncpa [#allocation4], 0  ;;  %s1052_s0 = inlined_call_operand.hbm [shape: f32[2,4,136], index: 0, kind: input, shape index: {}]   ;;  %s1053_s1 = inlined_call_operand.vmem [shape: f32[8,20], index: 1, kind: input, shape index: {}]   ;;  %s1054_s2 = inlined_call_operand.vmem [shape: f32[8,3], index: 2, kind: input, shape index: {}]   ;;  %s1055_s3 = inlined_call_operand.vmem [shape: f32[2], index: 3, kind: input, shape index: {}]   ;;  %s1056_s4 = inlined_call_operand.hbm [shape: f32[2,8,128], index: 4, kind: output, shape index: {}]  }
   0x1   :  { %11 = vsyncpa [#allocation4 + $0x1], 0 }
   0x2   :  { %12 = vsyncpa [#allocation6], 0 }
   0x3   :  { %13 = vsyncpa [#allocation5], 0 }
   0x4   :  { %15 = vsyncpa [#allocation5 + $0x1], 0  ;;  %s873_s15 = smov 0   ;;  %s875_s16 = smov 0  }
   0x5   :  { %s877_s17 = smov 0   ;;  %s879_s18 = smov 0  }
   0x6 LB: > { %s894_s19 = sadd.s32 4294967295, %s833_s18   ;;  %s609_s20 = sadd.s32 4294967294, %s833_s18   ;;  %s833_s18 = sphi %s879_s18, %s1068_s18   ;;  %s829_s17 = sphi %s877_s17, %s1067_s17   ;;  %s825_s16 = sphi %s875_s16, %s1066_s16   ;;  %s821_s15 = sphi %s873_s15, %s1065_s15  }
   0x7   : > { %p41_p0 = scmp.ne.s32.totalorder %s825_s16, %s821_s15  ;;  %p42_p1 = scmp.eq.s32.totalorder %s894_s19, 0 }
   0x8   : > { %p128_p2 = scmp.eq.s32.totalorder %s894_s19, 1  ;;  %p134_p3 = scmp.eq.s32.totalorder %s609_s20, 1 }
   0x9   : > { %p903_p4 = por %p42_p1, %p41_p0  ;;  %p610_p5 = scmp.ge.s32.totalorder %s833_s18, 1 }
   0xa   : > { %p908_p6 = por %p134_p3, %p41_p0  ;;  %p141_p7 = scmp.lt.s32.totalorder %s833_s18, 3 }
   0xb   : > { %s159_s25 = sshll.u32 %s1055_s3, 4  ;;  %s924_s27 = sadd.s32 1, %s833_s18   ;;  %s160_s25 = int_to_ptr.vmem [resolvable:$true] %s159_s25 }
   0xc   : > { %p916_p8 = pnand %p610_p5, %p141_p7  ;;  %s25_s28 = ssub.s32 %s833_s18, %s924_s27 }
   0xd   : > { %p26_p12 = scmp.eq.s32.totalorder %s25_s28, 0  ;;  %s28_s29 = sadd.s32 1, %s829_s17 }
   0xe   : > { %p653_p10 = pneg %p916_p8  ;;  %p35_p13 = scmp.ne.s32.totalorder %s829_s17, %s825_s16 }
   0xf   : > { %s835_s30 = smov [#allocation7]   ;;  %p36_p0 = scmp.eq.s32.totalorder %s833_s18, 0 }
  0x10   : > { %p654_p11 = pnand %p653_p10, %p42_p1  ;;  %p939_p3 = por %p128_p2, %p35_p13 }
  0x11   : > { %s934_s5 = scalar_select %p26_p12, %s829_s17, %s28_s29  }
  0x12   : > { %656 = dma.vmem_to_smem (!%p654_p11), %s160_s25, 16, %s835_s30, [#allocation6]  }
  0x13   : > { %s170_s7 = sand.u32 1, %s829_s17   ;;  %p37_p5 = por %p36_p0, %p35_p13 }
  0x14   : > { %p666_p7 = scmp.lt.s32.totalorder %s833_s18, 2  ;;  %s613_s8 = sshll.u32 %s170_s7, 3 }
  0x15   : > { %s636_s9 = sshll.u32 %s833_s18, 3  ;;  %s174_s14 = scalar_lea.vmem [#allocation3], %s613_s8 }
  0x16   : > { %s179_s12 = scalar_lea.hbm %s1052_s0, %s636_s9  ;;  %s183_s20 = sshll.u32 %s174_s14, 4  ;;  %s184_s20 = int_to_ptr.vmem [resolvable:$true] %s183_s20 }
  0x17   : > { %s181_s13 = sshll.u32 %s179_s12, 4  ;;  %p949_p10 = pnand %p666_p7, %p37_p5  ;;  %s182_s13 = int_to_ptr.hbm [resolvable:$true] %s181_s13 }
  0x18   : > { %s171_s24 = scalar_lea.sflag [#allocation4], %s170_s7  ;;  %s733_s25 = sshra.s32 %s182_s13, 4  ;;  %s734_s25 = int_to_ptr.hbm [resolvable:$true] %s733_s25 }
  0x19   : > { %s735_s28 = scalar_lea.hbm %s734_s25, 8  ;;  %p737_p11 = pneg %p949_p10 }
  0x1a   : > { %p736_p2 = scmp.ne.s32.totalorder %s734_s25, %s735_s28  ;;  %s740_s8 = scalar_lea.hbm %s1052_s0, 16 }
  0x1b   : > { %p741_p0 = scmp.lt.s32.totalorder %s734_s25, %s1052_s0  ;;  %p742_p5 = scmp.lt.s32.totalorder %s740_s8, %s735_s28 }
  0x1c   : > { %p738_p12 = pnand %p737_p11, %p736_p2 }
  0x1d   : > { %p743_p7 = por %p742_p5, %p741_p0 }
  0x1e   : > { %p739_p13 = pneg %p738_p12 }
  0x20   : > { %p744_p9 = pnand %p743_p7, %p739_p13 }
  0x22   : > { %747 = shalt.err (!%p744_p9)
}
  0x23   : > { %660 = dma.hbm_to_vmem [thread:$0]  (!%p949_p10), %s182_s13, 128, %s184_s20, %s171_s24  }
  0x24   : > { %192 = sbr.rel (%p916_p8) target bundleno = 1076 (0x434), region = 36  ;;  %s966_s7 = sand.u32 (!%p916_p8), 1, %s825_s16  }
  0x25   : > { %s1057_s11 = sshll.u32 (!%p916_p8), %s966_s7, 3  ;;  %s195_s12 = scalar_lea.sflag (!%p916_p8), [#allocation4], %s966_s7 }
  0x26   : > { %s972_s14 = scalar_lea.vmem (!%p916_p8), [#allocation3], %s1057_s11 }
  0x29   : > { %808 = dma.done.wait (%p903_p4), %s195_s12, 128  }
  0x2a   : > { %810 = vsyncadd (%p903_p4), %s195_s12, 4294967168 }
  0x2b   : > { %812 = dma.done.wait (%p42_p1), [#allocation6], 16  }
  0x2c   : > { %814 = vsyncadd (%p42_p1), [#allocation6], 4294967280 }
  0x2d   : > { %209 = sfence }
  0x2e   : > { %v240_v0 = vld [vmem:[%s972_s14] sm:$0xff]  ;;  %v239_v1 = vld [vmem:[%s1053_s1] sm:$0xff]  ;;  %s836_s20 = smov 120   ;;  %s837_s21 = smov 126   ;;  %vm257_vm0 = vcmask 1043456   ;;  %vm254_vm1 = vcmask 31744   ;;  %v233_v27 = vlaneseq }
  0x2f   : > { %245 = vst [vmem:[#allocation1] ss:$2 sm:$0xff] %v240_v0  ;;  %308 = vrot.lane.b32.xlu2 %v239_v1, %s836_s20  ;;  %s838_s23 = smov 124   ;;  %s839_s24 = smov 122   ;;  %v238_v10 = vld [vmem:[%s972_s14] sm:$0xf] }
  0x30   : > { %s840_s25 = smov 116   ;;  %s841_s28 = smov 112   ;;  %624 = vmatpush.msk.msra.mxu1 %vm257_vm0, %v238_v10  ;;  %vm252_vm2 = vcmask 1031168   ;;  %vm318_vm3 = vcmask 1014784   ;;  %vm358_vm4 = vcmask 998400   ;;  %vm398_vm5 = vcmask 982016  }
  0x31   : > { %625 = vmatmul.msk.f32.vlgmr.msra.gmra.mxu1 %vm254_vm1, %v239_v1  ;;  %v234_v31 = vand.u32 127, %v233_v27  ;;  %v842_v36 = vmov 0.0   ;;  %v1003_v41 = vld [vmem:[%s1054_s2] sm:$0xff]  ;;  %vm428_vm7 = vcmask 7168   ;;  %s231_s8 = sld [smem:[#allocation7]]  ;;  %s843_s29 = smov 0.0  }
  0x32   : > { %s620_s10 = sld [smem:[#allocation7 + $0x1]] }
  0x33   : > { %vm235_vm6 = vcmp.lt.s32.totalorder %v234_v31, 16 }
  0x34   : > { %v621_v37 = vsel %vm235_vm6, 1.0, %v842_v36 }
  0x36   : > { %v246_v2 = vld.sshfl [vmem:[#allocation1] sm:$0xff pattern:$0x75316420]  ;;  %v247_v3 = vld.sshfl [vmem:[#allocation1 + $0x8] sm:$0xff pattern:$0x75316420] }
  0x37   : > { %248 = vrot.lane.b32.xlu1 %v246_v2, %s837_s21  ;;  %311 = vst [vmem:[#allocation1] ss:$2 sm:$0xff] %v240_v0 }
  0x3e   : > { %v312_v4 = vld.sshfl [vmem:[#allocation1] sm:$0xff pattern:$0x75316420]  ;;  %v313_v5 = vld.sshfl [vmem:[#allocation1 + $0x8] sm:$0xff pattern:$0x75316420] }
  0x3f   : > { %250 = vrot.lane.b32.xlu1 %v247_v3, %s837_s21  ;;  %314 = vrot.lane.b32.xlu0 %v312_v4, %s838_s23  ;;  %351 = vst [vmem:[#allocation1] ss:$2 sm:$0xff] %v240_v0 }
  0x46   : > { %v353_v6 = vld.sshfl [vmem:[#allocation1 + $0x8] sm:$0xff pattern:$0x75316420]  ;;  %v352_v7 = vld.sshfl [vmem:[#allocation1] sm:$0xff pattern:$0x75316420] }
  0x47   : > { %316 = vrot.lane.b32.xlu0 %v313_v5, %s838_s23  ;;  %242 = vrot.lane.b32.xlu1 %v239_v1, %s838_s23  ;;  %391 = vst [vmem:[#allocation1] ss:$2 sm:$0xff] %v240_v0 }
  0x48   : > { %354 = vrot.lane.b32.xlu2 %v352_v7, %s839_s24 }
  0x4e   : > { %v393_v8 = vld.sshfl [vmem:[#allocation1 + $0x8] sm:$0xff pattern:$0x75316420]  ;;  %v392_v9 = vld.sshfl [vmem:[#allocation1] sm:$0xff pattern:$0x75316420] }
  0x4f   : > { %356 = vrot.lane.b32.xlu0 %v353_v6, %s839_s24  ;;  %396 = vrot.lane.b32.xlu1 %v393_v8, %s836_s20 }
  0x50   : > { %348 = vrot.lane.b32.xlu2 %v239_v1, %s840_s25 }
  0x57   : > { %394 = vrot.lane.b32.xlu0 %v392_v9, %s836_s20 }
  0x58   : > { %388 = vrot.lane.b32.xlu2 %v239_v1, %s841_s28 }
  0x89   : > { %v309_v12 = vpop.permute.xlu2 %308 }
  0xa2   : > { %v355_v16 = vpop.permute.xlu2 %354 }
  0xa9   : > { %v249_v11 = vpop.permute.xlu1 %248 }
  0xaa   : > { %v349_v20 = vpop.permute.xlu2 %348 }
  0xae   : > { %v302_v29 = vpop.f32.mrf.mxu1 }
  0xb1   : > { %v251_v13 = vpop.permute.xlu1 %250  ;;  %v315_v14 = vpop.permute.xlu0 %314 }
  0xb2   : > { %v253_v15 = vsel %vm252_vm2, %v249_v11, %v251_v13  ;;  %v389_v25 = vpop.permute.xlu2 %388 }
  0xb3   : > { %622 = vmatpush.msk.msra.mxu0 %vm257_vm0, %v253_v15 }
  0xb9   : > { %v317_v17 = vpop.permute.xlu0 %316  ;;  %v243_v18 = vpop.permute.xlu1 %242 }
  0xba   : > { %v319_v19 = vsel %vm318_vm3, %v315_v14, %v317_v17  ;;  %623 = vmatmul.msk.f32.vlgmr.msra.gmra.mxu0 %vm254_vm1, %v243_v18 }
  0xbb   : > { %626 = vmatpush.msk.msra.mxu2 %vm257_vm0, %v319_v19  ;;  %v847_v19 = vmov 2  }
  0xbc   : > { %627 = vmatmul.msk.f32.vlgmr.msra.gmra.mxu2 %vm254_vm1, %v309_v12  ;;  %v844_v12 = vmov 1   ;;  %715 = vset.pattern.permute.xlu0 %v847_v19 }
  0xbd   : > { %714 = vset.pattern.permute.xlu2 %v844_v12 }
  0xc1   : > { %v357_v21 = vpop.permute.xlu0 %356  ;;  %v397_v23 = vpop.permute.xlu1 %396 }
  0xc2   : > { %v359_v22 = vsel %vm358_vm4, %v355_v16, %v357_v21 }
  0xc3   : > { %628 = vmatpush.msk.msra.mxu3 %vm257_vm0, %v359_v22 }
  0xc4   : > { %629 = vmatmul.msk.f32.vlgmr.msra.gmra.mxu3 %vm254_vm1, %v349_v20 }
  0xc9   : > { %v395_v24 = vpop.permute.xlu0 %394 }
  0xca   : > { %v399_v26 = vsel %vm398_vm5, %v395_v24, %v397_v23 }
  0xcb   : > { %630 = vmatpush.msk.msrb.mxu0 %vm257_vm0, %v399_v26 }
  0xcc   : > { %631 = vmatmul.msk.f32.vlgmr.msrb.gmra.mxu0 %vm254_vm1, %v389_v25 }
 0x137   : > { %v277_v28 = vpop.f32.mrf.mxu0 }
 0x138   : > { %v303_v30 = vadd.f32 %v302_v29, %v277_v28 }
 0x13f   : > { %v341_v32 = vpop.f32.mrf.mxu2 }
 0x140   : > { %v344_v33 = vadd.f32 %v341_v32, %v303_v30 }
 0x147   : > { %v381_v34 = vpop.f32.mrf.mxu3 }
 0x148   : > { %v384_v35 = vadd.f32 %v381_v34, %v344_v33 }
 0x149   : > { %v421_v38 = vpop.f32.mrf.mxu0 }
 0x14a   : > { %v424_v39 = vadd.f32 %v421_v38, %v384_v35 }
 0x14c   : > { %v997_v40 = vmul.f32 %v621_v37, %v424_v39 }
 0x14e   : > { %426 = vadd.xlane.f32.xlu0 %v997_v40  ;;  %v452_v46 = vmul.f32 %v997_v40, %v997_v40 }
 0x1c1   : > { %v427_v42 = vpop.xlane.xlu0 %426 }
 0x1c2   : > { %v440_v43 = vmul.f32 %v427_v42, %v1003_v41  ;;  %v429_v44 = vsel %vm428_vm7, %v427_v42, 0.0 }
 0x1c3   : > { %430 = vadd.xlane.f32.xlu1 %v429_v44 }
 0x1c4   : > { %v441_v45 = vsel %vm428_vm7, %v440_v43, 0.0 }
 0x1c5   : > { %442 = vadd.xlane.f32.xlu2 %v441_v45 }
 0x1cd   : > { %453 = vadd.xlane.f32.xlu2 %v452_v46 }
 0x236   : > { %v431_v47 = vpop.xlane.xlu1 %430 }
 0x237   : > { %v432_v48 = vrot.slane %v431_v47, 4 }
 0x238   : > { %v443_v49 = vpop.xlane.xlu2 %442 }
 0x239   : > { %v433_v50 = vadd.f32 %v432_v48, %v431_v47  ;;  %v444_v51 = vrot.slane %v443_v49, 4 }
 0x23b   : > { %v434_v52 = vrot.slane %v433_v50, 2  ;;  %v445_v53 = vadd.f32 %v444_v51, %v443_v49 }
 0x23d   : > { %v446_v54 = vrot.slane %v445_v53, 2  ;;  %v435_v55 = vadd.f32 %v434_v52, %v433_v50 }
 0x23f   : > { %v436_v56 = vrot.slane %v435_v55, 1  ;;  %v447_v57 = vadd.f32 %v446_v54, %v445_v53 }
 0x240   : > { %v454_v58 = vpop.xlane.xlu2 %453 }
 0x241   : > { %v455_v59 = vrot.slane %v454_v58, 4  ;;  %v437_v60 = vadd.f32 %v436_v56, %v435_v55  ;;  %v448_v61 = vrot.slane %v447_v57, 1 }
 0x243   : > { %v456_v62 = vadd.f32 %v455_v59, %v454_v58  ;;  %637 = vpush %v437_v60  ;;  %v449_v63 = vadd.f32 %v448_v61, %v447_v57 }
 0x245   : > { %v457_v0 = vrot.slane %v456_v62, 2  ;;  %639 = vpush %v449_v63 }
 0x247   : > { %v458_v1 = vadd.f32 %v457_v0, %v456_v62 }
 0x249   : > { %v459_v2 = vrot.slane %v458_v1, 1 }
 0x24b   : > { %v460_v3 = vadd.f32 %v459_v2, %v458_v1 }
 0x24d   : > { %641 = vpush %v460_v3 }
 0x274   : > { %s638_s9 = spop %637 }
 0x275   : > { %s463_s12 = sadd.f32 %s638_s9, %s231_s8  ;;  %s846_s9 = smov 2  }
 0x276   : > { %s640_s14 = spop %639 }
 0x277   : > { %s464_s26 = smul.f32 2.0, %s640_s14 }
 0x278   : > { %s1008_s13 = smul.f32 0.0078125, %s463_s12 }
 0x27a   : > { %s469_s24 = smul.f32 %s1008_s13, %s1008_s13  ;;  %v487_v15 = vstv %s1008_s13  ;;  %s1063_s13 = sshll.u32 %s966_s7, 3 }
 0x27b   : > { %v488_v16 = vsub.f32 %v1003_v41, %v487_v15 }
 0x27e   : > { %s642_s20 = spop %641 }
 0x27f   : > { %s465_s21 = sadd.f32 %s642_s20, %s464_s26  ;;  %s229_s20 = scalar_lea.vmem [#allocation8], %s1063_s13 }
 0x281   : > { %s466_s23 = sadd.f32 %s620_s10, %s465_s21  ;;  %s633_s10 = sshll.u32 %s894_s19, 3 }
 0x282   : > { %s522_s26 = scalar_lea.hbm %s1056_s4, %s633_s10  ;;  %s524_s21 = sshll.u32 %s229_s20, 4  ;;  %s525_s21 = int_to_ptr.vmem [resolvable:$true] %s524_s21 }
 0x283   : > { %s468_s25 = smul.f32 0.0078125, %s466_s23  ;;  %s526_s23 = sshll.u32 %s522_s26, 4  ;;  %s527_s23 = int_to_ptr.hbm [resolvable:$true] %s526_s23 }
 0x285   : > { %s470_s28 = ssub.f32 %s468_s25, %s469_s24  ;;  %s512_s24 = scalar_lea.sflag [#allocation5], %s966_s7 }
 0x286   : > { %s777_s25 = sshra.s32 %s527_s23, 4  ;;  %s778_s25 = int_to_ptr.hbm [resolvable:$true] %s777_s25 }
 0x287   : > { %s471_s30 = smax.f32 %s843_s29, %s470_s28  ;;  %s779_s19 = scalar_lea.hbm %s778_s25, 8 }
 0x288   : > { %s472_s11 = sadd.f32 1e-08, %s471_s30  ;;  %p780_p1 = scmp.ne.s32.totalorder %s778_s25, %s779_s19 }
 0x289   : > { %s783_s30 = scalar_lea.hbm %s1056_s4, 16  ;;  %p784_p9 = scmp.lt.s32.totalorder %s778_s25, %s1056_s4 }
 0x28a   : > { %v473_v4 = vstv %s472_s11  ;;  %s845_s11 = smov 127   ;;  %p781_p4 = pnand %p780_p1, %p939_p3 }
 0x28b   : > { %716 = vrsqrt.f32 %v473_v4  ;;  %vm480_vm9 = vweird.f32 %v473_v4  ;;  %p785_p10 = scmp.lt.s32.totalorder %s783_s30, %s779_s19 }
 0x28c   : > { %p782_p8 = pneg %p781_p4 }
 0x28d   : > { %p786_p2 = por %p785_p10, %p784_p9 }
 0x28f   : > { %p787_p11 = pnand %p786_p2, %p782_p8 }
 0x291   : > { %v717_v5 = vpop.eup %716 }
 0x292   : > { %v475_v6 = vmul.f32 %v717_v5, %v473_v4  ;;  %vm481_vm8 = vweird.f32 %v717_v5 }
 0x293   : > { %vm482_vm10 = vmor %vm480_vm9, %vm481_vm8 }
 0x294   : > { %v476_v7 = vmul.f32 %v717_v5, %v475_v6 }
 0x296   : > { %v477_v8 = vmul.f32 0.5, %v476_v7 }
 0x298   : > { %v478_v9 = vsub.f32 1.5, %v477_v8 }
 0x29a   : > { %v479_v10 = vmul.f32 %v717_v5, %v478_v9 }
 0x29c   : > { %v483_v11 = vsel %vm482_vm10, %v717_v5, %v479_v10 }
 0x29d   : > { %643 = vpush %v483_v11 }
 0x2ce   : > { %s644_s8 = spop %643 }
 0x2cf   : > { %v485_v13 = vstv %s644_s8 }
 0x2d0   : > { %v486_v14 = vmul.f32 %v485_v13, %v1003_v41 }
 0x2d2   : > { %500 = vperm.xlu2 %714, %v486_v14   ;;  %490 = vrot.lane.b32.xlu0 %v486_v14, %s845_s11 }
 0x32c   : > { %v501_v22 = vpop.permute.xlu2 %500 }
 0x32d   : > { %v503_v23 = vmul.f32 %v501_v22, %v997_v40 }
 0x344   : > { %v491_v17 = vpop.permute.xlu0 %490 }
 0x345   : > { %v493_v18 = vmul.f32 %v491_v17, %v488_v16 }
 0x347   : > { %495 = vrot.lane.b32.xlu1 %v493_v18, %s846_s9 }
 0x3b9   : > { %v496_v20 = vpop.permute.xlu1 %495 }
 0x3ba   : > { %v498_v21 = vadd.f32 %v496_v20, %v1003_v41 }
 0x3bc   : > { %506 = vperm.xlu0 %715, %v498_v21  }
 0x42e   : > { %v507_v24 = vpop.permute.xlu0 %506 }
 0x42f   : > { %v509_v25 = vadd.f32 %v507_v24, %v503_v23 }
 0x431   : > { %510 = vst [vmem:[%s229_s20] sm:$0xff] %v509_v25 }
 0x432   : > { %790 = shalt.err (!%p787_p11)
}
 0x433   : > { %651 = dma.vmem_to_hbm [thread:$0]  (%p939_p3), %s525_s21, 128, %s527_s23, %s512_s24  }
 0x434 PF: > { %s538_s7 = sand.u32 1, %s821_s15   ;;  %p1064_p12 = scmp.ge.s32.totalorder %s833_s18, 2 }
 0x435   : > { %s539_s9 = scalar_lea.sflag [#allocation5], %s538_s7 }
 0x436   : > { %p662_p13 = pnand %p1064_p12, %p908_p6 }
 0x438   : > { %p663_p0 = pneg %p662_p13 }
 0x43a   : > { %816 = dma.done.wait (%p663_p0), %s539_s9, 128  }
 0x43b   : > { %818 = vsyncadd (%p663_p0), %s539_s9, 4294967168  ;;  %p18_p5 = scmp.ge.s32.totalorder %s924_s27, 4   ;;  %s1065_s15 = smov %s825_s16 }
 0x43c   : > { %s1066_s16 = smov %s829_s17  ;;  %s1067_s17 = smov %s934_s5 }
 0x43d   : > { %s1068_s18 = smov %s924_s27  ;;  %20 = sbr.rel (!%p18_p5) target bundleno = 6 (0x6), region = 86 }
 0x442   :  { %545 = vsyncpa [#allocation4], 1 }
 0x443   :  { %547 = vsyncpa [#allocation4 + $0x1], 1 }
 0x444   :  { %548 = vsyncpa [#allocation5], 1 }
 0x445   :  { %550 = vsyncpa [#allocation5 + $0x1], 1 }
 0x446   :  { %551 = vsyncpa [#allocation6], 1 }
 0x447   :  { %553 = vsyncpa [#allocation6 + $0x1], 1 }

</bundles_post_ra>
